<compile_context>
chip_gen: v6e
topology: v6e:2x2x1
jax: 0.10.0
libtpu: 0.0.40
codegen_flags: <defaults>
</compile_context>

<pallas_src>
import functools

import jax
import jax.numpy as jnp
from jax.experimental import pallas as pl
from jax.experimental.pallas import tpu as pltpu


LANE = 128


def _round_up(x: int, m: int) -> int:
    return ((x + m - 1) // m) * m


def _mlp_kernel(x_ref, w_ref, b_ref, o_ref, *, num_layers, in_dim,
                in_pad_max, out_pad):
    """Fused MLP.

    x_ref: (B, in_dim)               bf16
    w_ref: (L, in_pad_max, out_pad)  bf16  (transposed, zero-padded weights)
    b_ref: (L, 1, out_pad)           f32   (zero-padded biases)
    o_ref: (B, out_pad)              f32
    """
    h16 = x_ref[...]                      # (B, k) bf16, stays resident on-chip
    k = in_dim
    for layer in range(num_layers):       # static unroll (num_layers is small)
        w_l = w_ref[layer].reshape(in_pad_max, out_pad)
        if k != in_pad_max:
            w_l = w_l[:k, :]              # layer-0 small-K slice (rows >= k are zero anyway)
        acc = jnp.dot(h16, w_l, preferred_element_type=jnp.float32)   # MXU, f32 acc
        acc = acc + b_ref[layer].reshape(1, out_pad)                  # f32 bias (VPU)
        if layer < num_layers - 1:
            h16 = jnp.maximum(acc, 0.0).astype(jnp.bfloat16)          # ReLU + single bf16 cast
            k = out_pad
        else:
            o_ref[...] = acc.astype(o_ref.dtype)                      # lane-dense store


def predictor_forward(embedding, w_stacked, b_stacked, output_dim):
    """Fused forward matching Predictor.forward.

    embedding: (B, input_dim) float32
    w_stacked: (L, in_pad_max, out_pad) bfloat16
    b_stacked: (L, 1, out_pad) float32
    Returns (B, output_dim) float32.
    """
    B, in_dim = embedding.shape
    L, in_pad_max, out_pad = w_stacked.shape

    # Single bf16 cast in the wrapper; the matmul input is bf16 either way and
    # this halves the activation DMA bytes into the kernel.
    x16 = embedding.astype(jnp.bfloat16)

    kernel = functools.partial(
        _mlp_kernel, num_layers=L, in_dim=in_dim,
        in_pad_max=in_pad_max, out_pad=out_pad)

    vmem = pl.BlockSpec(memory_space=pltpu.MemorySpace.VMEM)
    out_pad_arr = pl.pallas_call(
        kernel,
        out_shape=jax.ShapeDtypeStruct((B, out_pad), jnp.float32),
        in_specs=[vmem, vmem, vmem],     # whole arrays, no grid / no double-buffering
        out_specs=vmem,
        # TODO(synk): when B / dims grow, switch to a real (M, N, K) grid:
        # batch axis "parallel" (fills both TCs on v7x), K last / "arbitrary"
        # with an f32 VMEM accumulator; 256-aligned tiles on v6e/v7x
        # (2x256x256 MXU), 128-aligned on v5e; batch tiles must be multiples
        # of 8 (16 for bf16); budget tiles for v7x's 64 MiB VMEM (roughly half
        # the v6e tile/Buffered budget) and set vmem_limit_bytes explicitly.
    )(x16, w_stacked, b_stacked)

    # Padded lanes are exactly zero; slice back to the real output width.
    return out_pad_arr[:, :output_dim]


def init_predictor_params(key, input_dim, output_dim, num_layers):
    """Stacked, padded parameters mirroring the PyTorch module's layers.

    Layer 0: Linear(input_dim, output_dim); layers 1..L-1:
    Linear(output_dim, output_dim).  Weights are stored transposed (in, out),
    stacked as (L, in_pad_max, out_pad) bf16 with zero padding (layer 0 uses
    only the first input_dim rows); biases stacked as (L, 1, out_pad) f32.
    """
    in_pad_max = max(_round_up(input_dim, LANE), _round_up(output_dim, LANE))
    out_pad = _round_up(output_dim, LANE)
    w = jnp.zeros((num_layers, in_pad_max, out_pad), jnp.float32)
    b = jnp.zeros((num_layers, 1, out_pad), jnp.float32)

    in_dim = input_dim
    for layer in range(num_layers):
        key, kw, kb = jax.random.split(key, 3)
        bound = 1.0 / float(in_dim) ** 0.5
        w_l = jax.random.uniform(kw, (in_dim, output_dim), jnp.float32, -bound, bound)
        b_l = jax.random.uniform(kb, (output_dim,), jnp.float32, -bound, bound)
        w = w.at[layer, :in_dim, :output_dim].set(w_l)
        b = b.at[layer, 0, :output_dim].set(b_l)
        in_dim = output_dim

    return w.astype(jnp.bfloat16), b


if __name__ == "__main__":
    # Small shapes consistent with the module's forward.
    batch = 8
    input_dim = 32
    output_dim = 32
    num_layers = 3

    key = jax.random.PRNGKey(0)
    key, k_x = jax.random.split(key)
    embedding = jax.random.normal(k_x, (batch, input_dim), jnp.float32)

    w_stacked, b_stacked = init_predictor_params(key, input_dim, output_dim, num_layers)

    out = predictor_forward(embedding, w_stacked, b_stacked, output_dim)
    out = jax.block_until_ready(out)

    # Reference: identical math (bf16 matmul inputs, f32 accumulate) in plain
    # JAX.  NOTE: the kernel intentionally runs the MXU in bf16; a strict f32
    # PyTorch Linear reference would differ by O(sqrt(in_dim) * bf16 eps).
    out_pad = w_stacked.shape[2]
    h16 = embedding.astype(jnp.bfloat16)
    k = input_dim
    for layer in range(num_layers):
        acc = jnp.dot(h16, w_stacked[layer, :k, :],
                      preferred_element_type=jnp.float32) + b_stacked[layer]
        if layer < num_layers - 1:
            h16 = jnp.maximum(acc, 0.0).astype(jnp.bfloat16)
            k = out_pad
    ref = acc[:, :output_dim]

    assert out.shape == (batch, output_dim)
    assert jnp.allclose(out, ref, atol=1e-3, rtol=1e-3), (
        float(jnp.max(jnp.abs(out - ref))))

    print("KERNEL_OK")
</pallas_src>

<mosaic_0001>
module attributes {stable_mosaic.version = 11 : i64} {
  func.func @_mlp_kernel(%arg0: memref<8x32xbf16, #tpu.memory_space<vmem>>, %arg1: memref<3x128x128xbf16, #tpu.memory_space<vmem>>, %arg2: memref<3x1x128xf32, #tpu.memory_space<vmem>>, %arg3: memref<8x128xf32, #tpu.memory_space<vmem>>) attributes {dimension_semantics = [], scalar_prefetch = 0 : i64, scratch_operands = 0 : i64, tpu.core_type = #tpu.core_type<tc>} {
    %c0 = arith.constant 0 : index
    %c0_0 = arith.constant 0 : index
    %0 = vector.load %arg0[%c0, %c0_0] : memref<8x32xbf16, #tpu.memory_space<vmem>>, vector<8x32xbf16>
    %c0_1 = arith.constant 0 : index
    %c0_2 = arith.constant 0 : index
    %c0_3 = arith.constant 0 : index
    %1 = vector.load %arg1[%c0_1, %c0_2, %c0_3] : memref<3x128x128xbf16, #tpu.memory_space<vmem>>, vector<1x128x128xbf16>
    %2 = vector.shape_cast %1 : vector<1x128x128xbf16> to vector<128x128xbf16>
    %3 = vector.extract_strided_slice %2 {offsets = [0, 0], sizes = [32, 128], strides = [1, 1]} : vector<128x128xbf16> to vector<32x128xbf16>
    %cst = arith.constant dense<0.000000e+00> : vector<8x128xf32>
    %4 = tpu.matmul %0, %3, %cst {dimension_numbers = #tpu.dot_dimension_numbers<[1], [0], [0], [1], [0, 0, 1, 1], [], []>} : vector<8x32xbf16>, vector<32x128xbf16>, vector<8x128xf32> -> vector<8x128xf32>
    %c0_4 = arith.constant 0 : index
    %c0_5 = arith.constant 0 : index
    %c0_6 = arith.constant 0 : index
    %5 = vector.load %arg2[%c0_4, %c0_5, %c0_6] : memref<3x1x128xf32, #tpu.memory_space<vmem>>, vector<1x1x128xf32>
    %6 = vector.shape_cast %5 : vector<1x1x128xf32> to vector<1x128xf32>
    %7 = vector.broadcast %6 : vector<1x128xf32> to vector<8x128xf32>
    %8 = arith.addf %4, %7 : vector<8x128xf32>
    %cst_7 = arith.constant 0.000000e+00 : f32
    %9 = vector.broadcast %cst_7 : f32 to vector<8x128xf32>
    %10 = arith.maximumf %8, %9 : vector<8x128xf32>
    %11 = arith.truncf %10 : vector<8x128xf32> to vector<8x128xbf16>
    %c1 = arith.constant 1 : index
    %c0_8 = arith.constant 0 : index
    %c0_9 = arith.constant 0 : index
    %12 = vector.load %arg1[%c1, %c0_8, %c0_9] : memref<3x128x128xbf16, #tpu.memory_space<vmem>>, vector<1x128x128xbf16>
    %13 = vector.shape_cast %12 : vector<1x128x128xbf16> to vector<128x128xbf16>
    %cst_10 = arith.constant dense<0.000000e+00> : vector<8x128xf32>
    %14 = tpu.matmul %11, %13, %cst_10 {dimension_numbers = #tpu.dot_dimension_numbers<[1], [0], [0], [1], [0, 0, 1, 1], [], []>} : vector<8x128xbf16>, vector<128x128xbf16>, vector<8x128xf32> -> vector<8x128xf32>
    %c1_11 = arith.constant 1 : index
    %c0_12 = arith.constant 0 : index
    %c0_13 = arith.constant 0 : index
    %15 = vector.load %arg2[%c1_11, %c0_12, %c0_13] : memref<3x1x128xf32, #tpu.memory_space<vmem>>, vector<1x1x128xf32>
    %16 = vector.shape_cast %15 : vector<1x1x128xf32> to vector<1x128xf32>
    %17 = vector.broadcast %16 : vector<1x128xf32> to vector<8x128xf32>
    %18 = arith.addf %14, %17 : vector<8x128xf32>
    %cst_14 = arith.constant 0.000000e+00 : f32
    %19 = vector.broadcast %cst_14 : f32 to vector<8x128xf32>
    %20 = arith.maximumf %18, %19 : vector<8x128xf32>
    %21 = arith.truncf %20 : vector<8x128xf32> to vector<8x128xbf16>
    %c2 = arith.constant 2 : index
    %c0_15 = arith.constant 0 : index
    %c0_16 = arith.constant 0 : index
    %22 = vector.load %arg1[%c2, %c0_15, %c0_16] : memref<3x128x128xbf16, #tpu.memory_space<vmem>>, vector<1x128x128xbf16>
    %23 = vector.shape_cast %22 : vector<1x128x128xbf16> to vector<128x128xbf16>
    %cst_17 = arith.constant dense<0.000000e+00> : vector<8x128xf32>
    %24 = tpu.matmul %21, %23, %cst_17 {dimension_numbers = #tpu.dot_dimension_numbers<[1], [0], [0], [1], [0, 0, 1, 1], [], []>} : vector<8x128xbf16>, vector<128x128xbf16>, vector<8x128xf32> -> vector<8x128xf32>
    %c2_18 = arith.constant 2 : index
    %c0_19 = arith.constant 0 : index
    %c0_20 = arith.constant 0 : index
    %25 = vector.load %arg2[%c2_18, %c0_19, %c0_20] : memref<3x1x128xf32, #tpu.memory_space<vmem>>, vector<1x1x128xf32>
    %26 = vector.shape_cast %25 : vector<1x1x128xf32> to vector<1x128xf32>
    %27 = vector.broadcast %26 : vector<1x128xf32> to vector<8x128xf32>
    %28 = arith.addf %24, %27 : vector<8x128xf32>
    %c0_21 = arith.constant 0 : index
    %c0_22 = arith.constant 0 : index
    %29 = vector.load %arg3[%c0_21, %c0_22] : memref<8x128xf32, #tpu.memory_space<vmem>>, vector<8x128xf32>
    tpu.vector_store %arg3[%c0_21, %c0_22], %28 {strides = array<i32>} : memref<8x128xf32, #tpu.memory_space<vmem>>, vector<8x128xf32>,
    return
  }
}

</mosaic_0001>

<bundles_post_ra>
// kernel: tpu_custom_call.1
= control target key start
LH: loop header
LB: loop body
LE: loop exit
PB: predicated region body
PF: predicated region fallthrough
CT: control target
= control target key end

     0   :  { %8 = vsyncpa [#allocation3], 0  ;;  %s610_s0 = inlined_call_operand.hbm [shape: bf16[8,32], index: 0, kind: input, shape index: {}]   ;;  %s611_s1 = inlined_call_operand.hbm [shape: bf16[3,128,128], index: 1, kind: input, shape index: {}]   ;;  %s612_s2 = inlined_call_operand.vmem [shape: f32[3,1,128], index: 2, kind: input, shape index: {}]   ;;  %s613_s3 = inlined_call_operand.hbm [shape: f32[8,128], index: 3, kind: output, shape index: {}]  }
   0x1   :  { %9 = vsyncpa [#allocation6], 0 }
   0x2   :  { %10 = vsyncpa [#allocation4], 0  ;;  %s541_s12 = smov [#allocation2]   ;;  %s542_s14 = smov [#allocation5]  }
   0x3   :  { %s17_s13 = sshll.u32 %s541_s12, 4  ;;  %s26_s15 = sshll.u32 %s542_s14, 4  ;;  %s18_s13 = int_to_ptr.vmem [resolvable:$true] %s17_s13  ;;  %s27_s15 = int_to_ptr.vmem [resolvable:$true] %s26_s15 }
   0x4   :  { %s483_s16 = scalar_lea.vmem %s18_s13, 64  ;;  %p488_p1 = scmp.lt.s32.totalorder %s18_s13, %s18_s13 }
   0x5   :  { %p484_p0 = scmp.ne.s32.totalorder %s18_s13, %s483_s16  ;;  %p489_p2 = scmp.lt.s32.totalorder %s483_s16, %s483_s16 }
   0x7   :  { %p490_p3 = por %p489_p2, %p488_p1 }
   0x9   :  { %p491_p4 = pnand %p490_p3, %p484_p0 }
   0xb   :  { %494 = shalt.err (!%p491_p4)
}
   0xc   :  { %20 = dma.hbm_to_vmem [thread:$0]  %s610_s0, 64, %s18_s13, [#allocation3]  }
   0xd   :  { %s503_s19 = scalar_lea.vmem %s27_s15, 3072  ;;  %p508_p6 = scmp.lt.s32.totalorder %s27_s15, %s27_s15 }
   0xe   :  { %p504_p5 = scmp.ne.s32.totalorder %s27_s15, %s503_s19  ;;  %p509_p7 = scmp.lt.s32.totalorder %s503_s19, %s503_s19 }
  0x10   :  { %p510_p8 = por %p509_p7, %p508_p6 }
  0x12   :  { %p511_p9 = pnand %p510_p8, %p504_p5 }
  0x14   :  { %514 = shalt.err (!%p511_p9)
}
  0x15   :  { %s543_s20 = smov 64   ;;  %s544_s21 = smov 4  }
  0x16   :  { %32 = dma.hbm_to_vmem [thread:$0]  %s611_s1, 3072, %s27_s15, [#allocation6], %s543_s20, %s543_s20, %s544_s21  }
  0x17   :  { %535 = dma.done.wait [#allocation3], 64  }
  0x18   :  { %536 = vsyncadd [#allocation3], 4294967232 }
  0x19   :  { %537 = dma.done.wait [#allocation6], 3072  }
  0x1a   :  { %538 = vsyncadd [#allocation6], 4294964224  ;;  %v545_v0 = vmov 0.0   ;;  %vm546_vm0 = vmmov 0   ;;  %v457_v1 = vld [vmem:[#allocation5 + $0x8] sm:$0xff]   ;;  %v458_v2 = vld [vmem:[#allocation5] sm:$0xff]  }
  0x1b   :  { %402 = vmatprep.subr.bf16.mxu0 %v545_v0  ;;  %406 = vmatprep.mubr.msk.bf16.mxu0 %vm546_vm0, %v545_v0  ;;  %v459_v3 = vld [vmem:[#allocation5 + $0x78] sm:$0xff]   ;;  %vm66_vm1 = vcmask 261120   ;;  %v460_v4 = vld [vmem:[#allocation5 + $0x70] sm:$0xff]   ;;  %v461_v6 = vld [vmem:[#allocation5 + $0x68] sm:$0xff]   ;;  %s547_s28 = smov [#allocation7]  }
  0x1c   :  { %410 = vmatprep.subr.bf16.mxu1 %v545_v0  ;;  %426 = vmatprep.mubr.msk.bf16.mxu1 %vm546_vm0, %v545_v0  ;;  %v42_v5 = vld [vmem:[#allocation2] sm:$0xf]  ;;  %v462_v7 = vld [vmem:[#allocation5 + $0x60] sm:$0xff]   ;;  %v464_v9 = vld [vmem:[#allocation5 + $0x50] sm:$0xff]   ;;  %s347_s29 = sshll.u32 %s547_s28, 4  ;;  %s348_s29 = int_to_ptr.vmem [resolvable:$true] %s347_s29 }
  0x1d   :  { %403 = vmatpush3.bf16.msra.mxu0 %v457_v1  ;;  %411 = vmatpush3.bf16.msra.mxu1 %v459_v3  ;;  %v463_v8 = vld [vmem:[#allocation5 + $0x58] sm:$0xff]   ;;  %v465_v10 = vld [vmem:[#allocation5 + $0x48] sm:$0xff]   ;;  %v466_v11 = vld [vmem:[#allocation5 + $0x40] sm:$0xff]   ;;  %s515_s30 = scalar_lea.vmem %s348_s29, 128  ;;  %p520_p11 = scmp.lt.s32.totalorder %s348_s29, %s348_s29 }
  0x1e   :  { %404 = vmatprep.subr.bf16.mxu0 %v545_v0  ;;  %412 = vmatprep.subr.bf16.mxu1 %v545_v0  ;;  %v467_v12 = vld [vmem:[#allocation5 + $0xb8] sm:$0xff]   ;;  %v468_v13 = vld [vmem:[#allocation5 + $0xb0] sm:$0xff]   ;;  %v469_v14 = vld [vmem:[#allocation5 + $0xa8] sm:$0xff]   ;;  %p516_p10 = scmp.ne.s32.totalorder %s348_s29, %s515_s30  ;;  %p521_p12 = scmp.lt.s32.totalorder %s515_s30, %s515_s30 }
  0x1f   :  { %v470_v15 = vld [vmem:[#allocation5 + $0xa0] sm:$0xff]   ;;  %v471_v16 = vld [vmem:[#allocation5 + $0x98] sm:$0xff]   ;;  %v472_v17 = vld [vmem:[#allocation5 + $0x90] sm:$0xff]  }
  0x20   :  { %v357_v18 = vld [vmem:[%s612_s2] ss:$0 sm:$0xff]  ;;  %v473_v26 = vld [vmem:[#allocation5 + $0x88] sm:$0xff]   ;;  %v474_v27 = vld [vmem:[#allocation5 + $0x80] sm:$0xff]   ;;  %p522_p13 = por %p521_p12, %p520_p11 }
  0x21   :  { %405 = vmatpush3.bf16.msra.mxu0 %v458_v2  ;;  %413 = vmatpush3.bf16.msra.mxu1 %v460_v4  ;;  %v362_v28 = vld [vmem:[%s612_s2 + $0x1] ss:$0 sm:$0xff]  ;;  %v372_v36 = vld [vmem:[%s612_s2 + $0x2] ss:$0 sm:$0xff] }
  0x22   :  { %430 = vmatprep.subr.bf16.mxu0 %v545_v0  ;;  %414 = vmatprep.subr.bf16.mxu1 %v545_v0  ;;  %p523_p0 = pnand %p522_p13, %p516_p10 }
  0x24   :  { %407 = vmatmul.mubr.msk.bf16.vlgmr.msra.gmra.mxu0 %vm66_vm1, %v42_v5 }
  0x25   :  { %446 = vmatprep.mubr.msk.bf16.mxu0 %vm546_vm0, %v545_v0  ;;  %415 = vmatpush3.bf16.msra.mxu1 %v461_v6 }
  0x26   :  { %416 = vmatprep.subr.bf16.mxu1 %v545_v0  ;;  %431 = vmatpush3.bf16.msra.mxu0 %v467_v12 }
  0x27   :  { %432 = vmatprep.subr.bf16.mxu0 %v545_v0 }
  0x29   :  { %417 = vmatpush3.bf16.msra.mxu1 %v462_v7 }
  0x2a   :  { %418 = vmatprep.subr.bf16.mxu1 %v545_v0  ;;  %433 = vmatpush3.bf16.msra.mxu0 %v468_v13 }
  0x2b   :  { %434 = vmatprep.subr.bf16.mxu0 %v545_v0 }
  0x2d   :  { %419 = vmatpush3.bf16.msra.mxu1 %v463_v8 }
  0x2e   :  { %420 = vmatprep.subr.bf16.mxu1 %v545_v0  ;;  %435 = vmatpush3.bf16.msra.mxu0 %v469_v14 }
  0x2f   :  { %436 = vmatprep.subr.bf16.mxu0 %v545_v0 }
  0x31   :  { %421 = vmatpush3.bf16.msra.mxu1 %v464_v9 }
  0x32   :  { %422 = vmatprep.subr.bf16.mxu1 %v545_v0  ;;  %437 = vmatpush3.bf16.msra.mxu0 %v470_v15 }
  0x33   :  { %438 = vmatprep.subr.bf16.mxu0 %v545_v0 }
  0x35   :  { %423 = vmatpush3.bf16.msra.mxu1 %v465_v10 }
  0x36   :  { %424 = vmatprep.subr.bf16.mxu1 %v545_v0  ;;  %439 = vmatpush3.bf16.msra.mxu0 %v471_v16 }
  0x37   :  { %440 = vmatprep.subr.bf16.mxu0 %v545_v0 }
  0x39   :  { %425 = vmatpush3.bf16.msra.mxu1 %v466_v11 }
  0x3a   :  { %441 = vmatpush3.bf16.msra.mxu0 %v472_v17 }
  0x3b   :  { %442 = vmatprep.subr.bf16.mxu0 %v545_v0 }
  0x3e   :  { %443 = vmatpush3.bf16.msra.mxu0 %v473_v26 }
  0x3f   :  { %444 = vmatprep.subr.bf16.mxu0 %v545_v0 }
  0x42   :  { %445 = vmatpush3.bf16.msra.mxu0 %v474_v27 }
  0xe4   :  { %v104_v19 = vpop.f32.mrf.mxu0 }
  0xe5   :  { %v105_v20 = vadd.f32 %v357_v18, %v104_v19 }
  0xe6   :  { %v408_v21 = vpop.f32.mrf.mxu0 }
  0xe7   :  { %v110_v22 = vmax.f32 %v105_v20, 0.0 }
  0xe8   :  { %v107_v23 = vpop.f32.mrf.mxu0 }
  0xe9   :  { %v111_v24 = vpack.c.bf16 %v110_v22, %v110_v22 }
  0xea   :  { %v409_v25 = vpop.f32.mrf.mxu0 }
  0xeb   :  { %427 = vmatmul.mubr.bf16.vlgmr.msra.gmra.mxu1 %v111_v24 }
 0x1ab   :  { %v219_v29 = vpop.f32.mrf.mxu1 }
 0x1ac   :  { %v220_v30 = vadd.f32 %v362_v28, %v219_v29 }
 0x1ad   :  { %v428_v31 = vpop.f32.mrf.mxu1 }
 0x1ae   :  { %v225_v32 = vmax.f32 %v220_v30, 0.0 }
 0x1af   :  { %v222_v33 = vpop.f32.mrf.mxu1 }
 0x1b0   :  { %v226_v34 = vpack.c.bf16 %v225_v32, %v225_v32 }
 0x1b1   :  { %v429_v35 = vpop.f32.mrf.mxu1 }
 0x1b2   :  { %447 = vmatmul.mubr.bf16.vlgmr.msra.gmra.mxu0 %v226_v34 }
 0x272   :  { %v334_v37 = vpop.f32.mrf.mxu0 }
 0x273   :  { %v335_v38 = vadd.f32 %v372_v36, %v334_v37 }
 0x274   :  { %v448_v39 = vpop.f32.mrf.mxu0 }
 0x275   :  { %340 = vst [vmem:[#allocation7] sm:$0xff] %v335_v38 }
 0x276   :  { %v337_v40 = vpop.f32.mrf.mxu0 }
 0x277   :  { %526 = shalt.err (!%p523_p0)
}
 0x278   :  { %350 = dma.vmem_to_hbm [thread:$0]  %s348_s29, 128, %s613_s3, [#allocation4]   ;;  %v449_v41 = vpop.f32.mrf.mxu0 }
 0x279   :  { %539 = dma.done.wait [#allocation4], 128  }
 0x27a   :  { %540 = vsyncadd [#allocation4], 4294967168 }
 0x27b   :  { %354 = vsyncpa [#allocation3], 1 }
 0x27c   :  { %355 = vsyncpa [#allocation6], 1 }
 0x27d   :  { %356 = vsyncpa [#allocation4], 1 }

</bundles_post_ra>
